<compile_context>
chip_gen: v7x
topology: tpu7x:2x2x1
jax: 0.10.0
libtpu: 0.0.40
codegen_flags: <defaults>
</compile_context>

<pallas_src>
import functools

import jax
import jax.numpy as jnp
from jax import lax
from jax.experimental import pallas as pl
from jax.experimental.pallas import tpu as pltpu


def rnn_fc_bn_kernel(xp_ref,     # [tile_t, B, H] bf16  pre-projected inputs (+ both RNN biases)
                     whh_ref,    # [H, H]  f32
                     wfc_ref,    # [H, Op] f32 (zero-padded cols O..Op)
                     bfc_ref,    # [1, Op] f32
                     gamma_ref,  # [1, Op] f32
                     beta_ref,   # [1, Op] f32
                     o_ref,      # [B, Op] f32
                     h_scr):     # VMEM scratch [B, H] f32 (hidden state carried across grid)
    t_blk = pl.program_id(0)

    @pl.when(t_blk == 0)
    def _init():
        h_scr[...] = jnp.zeros_like(h_scr)

    tile_t = xp_ref.shape[0]
    w_hh = whh_ref[...]  # resident weight, loaded once per tile

    # ---- RNN recurrence over this time tile:
    #      h_t = tanh(x_proj[t] + h_{t-1} @ W_hh)   (x_proj already holds x@W_ih + b_ih + b_hh)
    def step(t, h):
        pre = xp_ref[t].astype(jnp.float32) + jnp.dot(
            h, w_hh, preferred_element_type=jnp.float32)
        return jnp.tanh(pre)

    unroll = tile_t if tile_t <= 16 else 8  # bounded unroll: LLO visibility without vreg spills
    h_scr[...] = lax.fori_loop(0, tile_t, step, h_scr[...], unroll=unroll)

    # ---- Epilogue (only after the final time tile): Linear + BatchNorm1d (training mode)
    @pl.when(t_blk == pl.num_programs(0) - 1)
    def _finalize():
        h_last = h_scr[...]
        logits = jnp.dot(h_last, wfc_ref[...],
                         preferred_element_type=jnp.float32) + bfc_ref[...]      # [B, Op]
        mean = jnp.mean(logits, axis=0, keepdims=True)                           # batch mean
        var = jnp.mean((logits - mean) ** 2, axis=0, keepdims=True)              # biased variance
        norm = (logits - mean) * lax.rsqrt(var + 1e-5)
        o_ref[...] = norm * gamma_ref[...] + beta_ref[...]


def _pick_tile_t(T, cap=128):
    cap = min(cap, T)
    for cand in range(cap, 0, -1):
        if T % cand == 0:
            return cand
    return 1


def torch_model_forward(x_tokens, params, tile_t=None):
    """x_tokens: int32 [B, T] token ids.  Returns float32 [B, O]."""
    emb = params["embedding"]     # [V, E]
    w_ih = params["w_ih"]         # [E, H]
    b_ih = params["b_ih"]         # [1, H]
    w_hh = params["w_hh"]         # [H, H]
    b_hh = params["b_hh"]         # [1, H]
    w_fc = params["w_fc"]         # [H, O]
    b_fc = params["b_fc"]         # [1, O]
    gamma = params["bn_gamma"]    # [1, O]
    beta = params["bn_beta"]      # [1, O]

    B, T = x_tokens.shape
    H = w_hh.shape[0]
    O = w_fc.shape[1]
    O_pad = ((O + 127) // 128) * 128

    if tile_t is None:
        tile_t = _pick_tile_t(T)
    assert T % tile_t == 0, "tile_t must divide T"

    # --- Hoist the input projection out of the recurrence: project the whole embedding
    #     table once (tiny [V,E]@[E,H]) and fold BOTH RNN biases in; the per-token gather
    #     then replaces the per-step x@W_ih matmul + bias adds.
    emb_proj = jnp.dot(emb, w_ih, preferred_element_type=jnp.float32) + b_ih + b_hh   # [V, H]
    # Gather directly into time-major layout (transpose the tiny id matrix, not the
    # activations); bf16 halves HBM/VMEM traffic on the only sequence-sized tensor.
    x_proj = jnp.take(emb_proj.astype(jnp.bfloat16), x_tokens.T, axis=0)              # [T, B, H]

    # --- Pad FC / BN params so the output (and its store path) is lane-dense (128).
    pad = O_pad - O
    w_fc_p = jnp.pad(w_fc, ((0, 0), (0, pad)))
    b_fc_p = jnp.pad(b_fc, ((0, 0), (0, pad)))
    gamma_p = jnp.pad(gamma, ((0, 0), (0, pad)))
    beta_p = jnp.pad(beta, ((0, 0), (0, pad)))

    grid = (T // tile_t,)

    # VMEM budget: double-buffered x tile + resident weights / output / h scratch
    # (4x margin for lane-padding of narrow dims), clamped to stay v7x-safe (64 MiB phys).
    x_blk_bytes = tile_t * B * H * 2
    resident_bytes = (H * H + H * O_pad + 3 * O_pad) * 4 + B * H * 4 + B * O_pad * 4
    vmem_limit = int(min(max(4 * (2 * x_blk_bytes + resident_bytes), 32 << 20), 48 << 20))

    cost = pl.CostEstimate(
        flops=2 * T * B * H * H + 2 * B * H * O_pad,
        transcendentals=T * B * H,
        bytes_accessed=x_proj.size * 2 + (H * H + H * O_pad + 3 * O_pad) * 4 + B * O_pad * 4,
    )

    out_pad = pl.pallas_call(
        rnn_fc_bn_kernel,
        out_shape=jax.ShapeDtypeStruct((B, O_pad), jnp.float32),
        grid_spec=pltpu.PrefetchScalarGridSpec(
            num_scalar_prefetch=0,
            grid=grid,
            in_specs=[
                pl.BlockSpec((tile_t, B, H), lambda t: (t, 0, 0)),  # streamed over T
                pl.BlockSpec((H, H), lambda t: (0, 0)),             # resident weights
                pl.BlockSpec((H, O_pad), lambda t: (0, 0)),
                pl.BlockSpec((1, O_pad), lambda t: (0, 0)),
                pl.BlockSpec((1, O_pad), lambda t: (0, 0)),
                pl.BlockSpec((1, O_pad), lambda t: (0, 0)),
            ],
            out_specs=pl.BlockSpec((B, O_pad), lambda t: (0, 0)),
            scratch_shapes=[pltpu.VMEM((B, H), jnp.float32)],
        ),
        compiler_params=pltpu.CompilerParams(
            dimension_semantics=("arbitrary",),  # T axis carries the hidden state
            vmem_limit_bytes=vmem_limit,
        ),
        cost_estimate=cost,
    )(x_proj, w_hh, w_fc_p, b_fc_p, gamma_p, beta_p)

    return out_pad[:, :O]


def reference_forward(x_tokens, params):
    """Pure-JAX reference of the same forward (same pre-projection / bf16 gather path)."""
    emb_proj = (jnp.dot(params["embedding"], params["w_ih"],
                        preferred_element_type=jnp.float32)
                + params["b_ih"] + params["b_hh"])
    x_proj = jnp.take(emb_proj.astype(jnp.bfloat16), x_tokens.T, axis=0).astype(jnp.float32)
    B = x_tokens.shape[0]
    H = params["w_hh"].shape[0]

    def step(h, x_t):
        h = jnp.tanh(x_t + jnp.dot(h, params["w_hh"], preferred_element_type=jnp.float32))
        return h, None

    h_last, _ = lax.scan(step, jnp.zeros((B, H), jnp.float32), x_proj)
    logits = jnp.dot(h_last, params["w_fc"],
                     preferred_element_type=jnp.float32) + params["b_fc"]
    mean = jnp.mean(logits, axis=0, keepdims=True)
    var = jnp.mean((logits - mean) ** 2, axis=0, keepdims=True)
    return ((logits - mean) * lax.rsqrt(var + 1e-5)) * params["bn_gamma"] + params["bn_beta"]


def init_params(key, vocab_size, embedding_dim, hidden_size, output_size):
    ks = jax.random.split(key, 6)
    scale = 0.1
    return {
        "embedding": scale * jax.random.normal(ks[0], (vocab_size, embedding_dim), jnp.float32),
        # RNN weights stored pre-transposed for right-multiplication.
        "w_ih": scale * jax.random.normal(ks[1], (embedding_dim, hidden_size), jnp.float32),
        "b_ih": scale * jax.random.normal(ks[2], (1, hidden_size), jnp.float32),
        "w_hh": scale * jax.random.normal(ks[3], (hidden_size, hidden_size), jnp.float32),
        "b_hh": scale * jax.random.normal(ks[4], (1, hidden_size), jnp.float32),
        "w_fc": scale * jax.random.normal(ks[5], (hidden_size, output_size), jnp.float32),
        "b_fc": jnp.zeros((1, output_size), jnp.float32),
        # BatchNorm1d defaults: gamma=1, beta=0 (training mode -> batch statistics).
        "bn_gamma": jnp.ones((1, output_size), jnp.float32),
        "bn_beta": jnp.zeros((1, output_size), jnp.float32),
    }


if __name__ == "__main__":
    vocab_size, embedding_dim, hidden_size, output_size = 30, 16, 32, 10
    batch, seq = 8, 8  # batch=8 also fills the sublane dimension

    key = jax.random.PRNGKey(0)
    k_param, k_tok = jax.random.split(key)
    params = init_params(k_param, vocab_size, embedding_dim, hidden_size, output_size)
    x_tokens = jax.random.randint(k_tok, (batch, seq), 0, vocab_size, dtype=jnp.int32)

    fwd = jax.jit(functools.partial(torch_model_forward, tile_t=4))  # grid=(2,): exercises h carry
    y = fwd(x_tokens, params)
    jax.block_until_ready(y)
    assert y.shape == (batch, output_size) and y.dtype == jnp.float32
    assert bool(jnp.all(jnp.isfinite(y)))

    y_ref = jax.jit(reference_forward)(x_tokens, params)
    jax.block_until_ready(y_ref)
    max_err = float(jnp.max(jnp.abs(y - y_ref)))
    assert max_err < 1e-1, f"kernel vs reference max abs diff = {max_err}"

    print("KERNEL_OK")
</pallas_src>

<mosaic_0001>
module attributes {stable_mosaic.version = 11 : i64} {
  func.func @rnn_fc_bn_kernel(%arg0: i32, %arg1: memref<4x8x32xbf16, #tpu.memory_space<vmem>>, %arg2: memref<32x32xf32, #tpu.memory_space<vmem>>, %arg3: memref<32x128xf32, #tpu.memory_space<vmem>>, %arg4: memref<1x128xf32, #tpu.memory_space<vmem>>, %arg5: memref<1x128xf32, #tpu.memory_space<vmem>>, %arg6: memref<1x128xf32, #tpu.memory_space<vmem>>, %arg7: memref<8x128xf32, #tpu.memory_space<vmem>>, %arg8: memref<8x32xf32, #tpu.memory_space<vmem>>) attributes {dimension_semantics = [#tpu.dimension_semantics<arbitrary>], iteration_bounds = array<i64: 2>, scalar_prefetch = 0 : i64, scratch_operands = 1 : i64, tpu.core_type = #tpu.core_type<tc>, window_params = [{transform_indices = @transform_0, window_bounds = array<i64: 4, 8, 32>}, {pipeline_mode = #tpu.pipeline_mode<synchronous>, transform_indices = @transform_1, window_bounds = array<i64: 32, 32>}, {pipeline_mode = #tpu.pipeline_mode<synchronous>, transform_indices = @transform_2, window_bounds = array<i64: 32, 128>}, {pipeline_mode = #tpu.pipeline_mode<synchronous>, transform_indices = @transform_3, window_bounds = array<i64: 1, 128>}, {pipeline_mode = #tpu.pipeline_mode<synchronous>, transform_indices = @transform_4, window_bounds = array<i64: 1, 128>}, {pipeline_mode = #tpu.pipeline_mode<synchronous>, transform_indices = @transform_5, window_bounds = array<i64: 1, 128>}, {pipeline_mode = #tpu.pipeline_mode<synchronous>, transform_indices = @transform_6, window_bounds = array<i64: 8, 128>}]} {
    %c0_i32 = arith.constant 0 : i32
    %0 = arith.cmpi eq, %arg0, %c0_i32 : i32
    %1 = arith.extui %0 : i1 to i32
    %c0_i32_0 = arith.constant 0 : i32
    %2 = arith.cmpi ne, %1, %c0_i32_0 : i32
    scf.if %2 {
      %cst_20 = arith.constant 0.000000e+00 : f32
      %37 = vector.broadcast %cst_20 : f32 to vector<8x32xf32>
      %c0_21 = arith.constant 0 : index
      %c0_22 = arith.constant 0 : index
      %38 = vector.load %arg8[%c0_21, %c0_22] : memref<8x32xf32, #tpu.memory_space<vmem>>, vector<8x32xf32>
      tpu.vector_store %arg8[%c0_21, %c0_22], %37 {strides = array<i32>} : memref<8x32xf32, #tpu.memory_space<vmem>>, vector<8x32xf32>,
    } else {
    }
    %c0 = arith.constant 0 : index
    %c0_1 = arith.constant 0 : index
    %3 = vector.load %arg2[%c0, %c0_1] : memref<32x32xf32, #tpu.memory_space<vmem>>, vector<32x32xf32>
    %c0_2 = arith.constant 0 : index
    %c0_3 = arith.constant 0 : index
    %4 = vector.load %arg8[%c0_2, %c0_3] : memref<8x32xf32, #tpu.memory_space<vmem>>, vector<8x32xf32>
    %c0_i32_4 = arith.constant 0 : i32
    %5 = arith.index_cast %c0_i32_4 : i32 to index
    %c0_5 = arith.constant 0 : index
    %c0_6 = arith.constant 0 : index
    %6 = vector.load %arg1[%5, %c0_5, %c0_6] : memref<4x8x32xbf16, #tpu.memory_space<vmem>>, vector<1x8x32xbf16>
    %7 = vector.shape_cast %6 : vector<1x8x32xbf16> to vector<8x32xbf16>
    %8 = arith.extf %7 : vector<8x32xbf16> to vector<8x32xf32>
    %cst = arith.constant dense<0.000000e+00> : vector<8x32xf32>
    %9 = tpu.matmul %4, %3, %cst {dimension_numbers = #tpu.dot_dimension_numbers<[1], [0], [0], [1], [0, 0, 1, 1], [], []>} : vector<8x32xf32>, vector<32x32xf32>, vector<8x32xf32> -> vector<8x32xf32>
    %10 = arith.addf %8, %9 : vector<8x32xf32>
    %11 = math.tanh %10 : vector<8x32xf32>
    %c1_i32 = arith.constant 1 : i32
    %12 = arith.index_cast %c1_i32 : i32 to index
    %c0_7 = arith.constant 0 : index
    %c0_8 = arith.constant 0 : index
    %13 = vector.load %arg1[%12, %c0_7, %c0_8] : memref<4x8x32xbf16, #tpu.memory_space<vmem>>, vector<1x8x32xbf16>
    %14 = vector.shape_cast %13 : vector<1x8x32xbf16> to vector<8x32xbf16>
    %15 = arith.extf %14 : vector<8x32xbf16> to vector<8x32xf32>
    %cst_9 = arith.constant dense<0.000000e+00> : vector<8x32xf32>
    %16 = tpu.matmul %11, %3, %cst_9 {dimension_numbers = #tpu.dot_dimension_numbers<[1], [0], [0], [1], [0, 0, 1, 1], [], []>} : vector<8x32xf32>, vector<32x32xf32>, vector<8x32xf32> -> vector<8x32xf32>
    %17 = arith.addf %15, %16 : vector<8x32xf32>
    %18 = math.tanh %17 : vector<8x32xf32>
    %c2_i32 = arith.constant 2 : i32
    %19 = arith.index_cast %c2_i32 : i32 to index
    %c0_10 = arith.constant 0 : index
    %c0_11 = arith.constant 0 : index
    %20 = vector.load %arg1[%19, %c0_10, %c0_11] : memref<4x8x32xbf16, #tpu.memory_space<vmem>>, vector<1x8x32xbf16>
    %21 = vector.shape_cast %20 : vector<1x8x32xbf16> to vector<8x32xbf16>
    %22 = arith.extf %21 : vector<8x32xbf16> to vector<8x32xf32>
    %cst_12 = arith.constant dense<0.000000e+00> : vector<8x32xf32>
    %23 = tpu.matmul %18, %3, %cst_12 {dimension_numbers = #tpu.dot_dimension_numbers<[1], [0], [0], [1], [0, 0, 1, 1], [], []>} : vector<8x32xf32>, vector<32x32xf32>, vector<8x32xf32> -> vector<8x32xf32>
    %24 = arith.addf %22, %23 : vector<8x32xf32>
    %25 = math.tanh %24 : vector<8x32xf32>
    %c3_i32 = arith.constant 3 : i32
    %26 = arith.index_cast %c3_i32 : i32 to index
    %c0_13 = arith.constant 0 : index
    %c0_14 = arith.constant 0 : index
    %27 = vector.load %arg1[%26, %c0_13, %c0_14] : memref<4x8x32xbf16, #tpu.memory_space<vmem>>, vector<1x8x32xbf16>
    %28 = vector.shape_cast %27 : vector<1x8x32xbf16> to vector<8x32xbf16>
    %29 = arith.extf %28 : vector<8x32xbf16> to vector<8x32xf32>
    %cst_15 = arith.constant dense<0.000000e+00> : vector<8x32xf32>
    %30 = tpu.matmul %25, %3, %cst_15 {dimension_numbers = #tpu.dot_dimension_numbers<[1], [0], [0], [1], [0, 0, 1, 1], [], []>} : vector<8x32xf32>, vector<32x32xf32>, vector<8x32xf32> -> vector<8x32xf32>
    %31 = arith.addf %29, %30 : vector<8x32xf32>
    %32 = math.tanh %31 : vector<8x32xf32>
    %c4_i32 = arith.constant 4 : i32
    %c0_16 = arith.constant 0 : index
    %c0_17 = arith.constant 0 : index
    %33 = vector.load %arg8[%c0_16, %c0_17] : memref<8x32xf32, #tpu.memory_space<vmem>>, vector<8x32xf32>
    tpu.vector_store %arg8[%c0_16, %c0_17], %32 {strides = array<i32>} : memref<8x32xf32, #tpu.memory_space<vmem>>, vector<8x32xf32>,
    %c1_i32_18 = arith.constant 1 : i32
    %34 = arith.cmpi eq, %arg0, %c1_i32_18 : i32
    %35 = arith.extui %34 : i1 to i32
    %c0_i32_19 = arith.constant 0 : i32
    %36 = arith.cmpi ne, %35, %c0_i32_19 : i32
    scf.if %36 {
      %c0_20 = arith.constant 0 : index
      %c0_21 = arith.constant 0 : index
      %37 = vector.load %arg8[%c0_20, %c0_21] : memref<8x32xf32, #tpu.memory_space<vmem>>, vector<8x32xf32>
      %c0_22 = arith.constant 0 : index
      %c0_23 = arith.constant 0 : index
      %38 = vector.load %arg3[%c0_22, %c0_23] : memref<32x128xf32, #tpu.memory_space<vmem>>, vector<32x128xf32>
      %cst_24 = arith.constant dense<0.000000e+00> : vector<8x128xf32>
      %39 = tpu.matmul %37, %38, %cst_24 {dimension_numbers = #tpu.dot_dimension_numbers<[1], [0], [0], [1], [0, 0, 1, 1], [], []>} : vector<8x32xf32>, vector<32x128xf32>, vector<8x128xf32> -> vector<8x128xf32>
      %c0_25 = arith.constant 0 : index
      %c0_26 = arith.constant 0 : index
      %40 = vector.load %arg4[%c0_25, %c0_26] : memref<1x128xf32, #tpu.memory_space<vmem>>, vector<1x128xf32>
      %41 = vector.broadcast %40 : vector<1x128xf32> to vector<8x128xf32>
      %42 = arith.addf %39, %41 : vector<8x128xf32>
      %cst_27 = arith.constant dense<0.000000e+00> : vector<128xf32>
      %43 = vector.multi_reduction <add>, %42, %cst_27 [0] : vector<8x128xf32> to vector<128xf32>
      %44 = vector.shape_cast %43 : vector<128xf32> to vector<1x128xf32>
      %cst_28 = arith.constant 8.000000e+00 : f32
      %45 = vector.broadcast %cst_28 : f32 to vector<1x128xf32>
      %46 = arith.divf %44, %45 : vector<1x128xf32>
      %47 = vector.broadcast %46 : vector<1x128xf32> to vector<8x128xf32>
      %48 = arith.subf %42, %47 : vector<8x128xf32>
      %49 = arith.mulf %48, %48 : vector<8x128xf32>
      %cst_29 = arith.constant dense<0.000000e+00> : vector<128xf32>
      %50 = vector.multi_reduction <add>, %49, %cst_29 [0] : vector<8x128xf32> to vector<128xf32>
      %51 = vector.shape_cast %50 : vector<128xf32> to vector<1x128xf32>
      %cst_30 = arith.constant 8.000000e+00 : f32
      %52 = vector.broadcast %cst_30 : f32 to vector<1x128xf32>
      %53 = arith.divf %51, %52 : vector<1x128xf32>
      %54 = vector.broadcast %46 : vector<1x128xf32> to vector<8x128xf32>
      %55 = arith.subf %42, %54 : vector<8x128xf32>
      %cst_31 = arith.constant 9.99999974E-6 : f32
      %56 = vector.broadcast %cst_31 : f32 to vector<1x128xf32>
      %57 = arith.addf %53, %56 : vector<1x128xf32>
      %58 = math.rsqrt %57 : vector<1x128xf32>
      %59 = vector.broadcast %58 : vector<1x128xf32> to vector<8x128xf32>
      %60 = arith.mulf %55, %59 : vector<8x128xf32>
      %c0_32 = arith.constant 0 : index
      %c0_33 = arith.constant 0 : index
      %61 = vector.load %arg5[%c0_32, %c0_33] : memref<1x128xf32, #tpu.memory_space<vmem>>, vector<1x128xf32>
      %62 = vector.broadcast %61 : vector<1x128xf32> to vector<8x128xf32>
      %63 = arith.mulf %60, %62 : vector<8x128xf32>
      %c0_34 = arith.constant 0 : index
      %c0_35 = arith.constant 0 : index
      %64 = vector.load %arg6[%c0_34, %c0_35] : memref<1x128xf32, #tpu.memory_space<vmem>>, vector<1x128xf32>
      %65 = vector.broadcast %64 : vector<1x128xf32> to vector<8x128xf32>
      %66 = arith.addf %63, %65 : vector<8x128xf32>
      %c0_36 = arith.constant 0 : index
      %c0_37 = arith.constant 0 : index
      %67 = vector.load %arg7[%c0_36, %c0_37] : memref<8x128xf32, #tpu.memory_space<vmem>>, vector<8x128xf32>
      tpu.vector_store %arg7[%c0_36, %c0_37], %66 {strides = array<i32>} : memref<8x128xf32, #tpu.memory_space<vmem>>, vector<8x128xf32>,
    } else {
    }
    return
  }
  func.func @transform_0(%arg0: i32) -> (i32, i32, i32) {
    %c0_i32 = arith.constant 0 : i32
    %c0_i32_0 = arith.constant 0 : i32
    %c0_i32_1 = arith.constant 0 : i32
    return %arg0, %c0_i32, %c0_i32_0 : i32, i32, i32
  }
  func.func @transform_1(%arg0: i32) -> (i32, i32) {
    %c0_i32 = arith.constant 0 : i32
    %c0_i32_0 = arith.constant 0 : i32
    %c0_i32_1 = arith.constant 0 : i32
    return %c0_i32, %c0_i32_0 : i32, i32
  }
  func.func @transform_2(%arg0: i32) -> (i32, i32) {
    %c0_i32 = arith.constant 0 : i32
    %c0_i32_0 = arith.constant 0 : i32
    %c0_i32_1 = arith.constant 0 : i32
    return %c0_i32, %c0_i32_0 : i32, i32
  }
  func.func @transform_3(%arg0: i32) -> (i32, i32) {
    %c0_i32 = arith.constant 0 : i32
    %c0_i32_0 = arith.constant 0 : i32
    %c0_i32_1 = arith.constant 0 : i32
    return %c0_i32, %c0_i32_0 : i32, i32
  }
  func.func @transform_4(%arg0: i32) -> (i32, i32) {
    %c0_i32 = arith.constant 0 : i32
    %c0_i32_0 = arith.constant 0 : i32
    %c0_i32_1 = arith.constant 0 : i32
    return %c0_i32, %c0_i32_0 : i32, i32
  }
  func.func @transform_5(%arg0: i32) -> (i32, i32) {
    %c0_i32 = arith.constant 0 : i32
    %c0_i32_0 = arith.constant 0 : i32
    %c0_i32_1 = arith.constant 0 : i32
    return %c0_i32, %c0_i32_0 : i32, i32
  }
  func.func @transform_6(%arg0: i32) -> (i32, i32) {
    %c0_i32 = arith.constant 0 : i32
    %c0_i32_0 = arith.constant 0 : i32
    %c0_i32_1 = arith.constant 0 : i32
    return %c0_i32, %c0_i32_0 : i32, i32
  }
}

</mosaic_0001>

<bundles_post_ra>
// kernel: torch_model_forward.1
= control target key start
LH: loop header
LB: loop body
LE: loop exit
PB: predicated region body
PF: predicated region fallthrough
CT: control target
= control target key end

     0   :  { %11 = vsyncpa [#allocation4], 0  ;;  %s982_s21 = smov 0   ;;  %s1071_s0 = inlined_call_operand.vmem [shape: bf16[8,8,32], index: 0, kind: input, shape index: {}]   ;;  %s1072_s1 = inlined_call_operand.vmem [shape: f32[32,32], index: 1, kind: input, shape index: {}]   ;;  %s1073_s2 = inlined_call_operand.vmem [shape: f32[32,128], index: 2, kind: input, shape index: {}]   ;;  %s1074_s3 = inlined_call_operand.vmem [shape: f32[1,128], index: 3, kind: input, shape index: {}]   ;;  %s1075_s4 = inlined_call_operand.vmem [shape: f32[1,128], index: 4, kind: input, shape index: {}]   ;;  %s1076_s5 = inlined_call_operand.vmem [shape: f32[1,128], index: 5, kind: input, shape index: {}]   ;;  %s1077_s6 = inlined_call_operand.hbm [shape: f32[8,128], index: 6, kind: output, shape index: {}]  }
   0x1 LB: > { %s988_s22 = sadd.s32 4294967295, %s937_s21   ;;  %p739_p0 = scmp.ge.s32.totalorder %s937_s21, 1  ;;  %s937_s21 = sphi %s982_s21, %s17_s21  }
   0x2   : > { %p209_p1 = scmp.lt.s32.totalorder %s937_s21, 3 }
   0x4   : > { %p210_p2 = pnand %p739_p0, %p209_p1 }
   0x5   : > { %s740_s23 = sshll.u32 (!%p210_p2), %s988_s22, 2  ;;  %p742_p4 = scmp.ne.s32.totalorder (!%p210_p2), %s988_s22, 0 }
   0x6   : > { %213 = sbr.rel (%p210_p2) target bundleno = 1229 (0x4cd), region = 44  ;;  %p235_p3 = scmp.lt.s32.totalorder (!%p210_p2), %s740_s23, 7 }
   0xd   : > { %s1079_s23 = smov (!%p235_p3, %s740_s23), 7  ;;  %243 = sbr.rel (%p742_p4) target bundleno = 20 (0x14), region = 48 }
   0xe   : > { %s741_s24 = sshll.u32 %s1079_s23, 2  ;;  %vm244_vm0 = vcmask (!%p742_p4), 261120   ;;  %v939_v0 = vmov (!%p742_p4), 0.0  }
   0xf   : > { %s996_s27 = scalar_lea.vmem %s1071_s0, %s741_s24  ;;  %245 = vst.msk [vmem:[#allocation2] sm:$0xff] (!%p742_p4), %vm244_vm0, %v939_v0 }
  0x14 PF: > { %v246_v1 = vld [vmem:[%s1072_s1] sm:$0xff]  ;;  %v247_v2 = vld [vmem:[%s1072_s1 + $0x8] sm:$0xff]  ;;  %v248_v3 = vld [vmem:[%s1072_s1 + $0x10] sm:$0xff]  ;;  %v940_v4 = vmov 0.0|0.0   ;;  %vm941_vm1 = vmmov 0   ;;  %v942_v7 = vmov 0.0  }
  0x15   : > { %839 = vmatprep.subr.bf16.mxu0 %v940_v4  ;;  %v840_v5 = vpack.c.bf16 %v247_v2, %v246_v1  ;;  %v249_v6 = vld [vmem:[%s1072_s1 + $0x18] sm:$0xff]  ;;  %792 = vmatprep.mubr.msk.f32.mxu0 %vm941_vm1, %v942_v7  ;;  %vm253_vm2 = vcmask 261120   ;;  %v251_v10 = vld [vmem:[%s996_s27] sm:$0xff]   ;;  %v746_v21 = vld [vmem:[%s996_s27 + $0x8] sm:$0xff]   ;;  %p750_p5 = scmp.ne.s32.totalorder %s988_s22, 1 }
  0x16   : > { %845 = vmatprep.subr.bf16.mxu1 %v940_v4  ;;  %803 = vmatprep.mubr.msk.f32.mxu1 %vm941_vm1, %v942_v7  ;;  %v843_v8 = vpack.c.bf16 %v249_v6, %v248_v3  ;;  %v250_v9 = vld [vmem:[#allocation2] sm:$0xff]  ;;  %v252_v11 = vunpack.c.l.bf16 %v251_v10  ;;  %v331_v16 = vunpack.c.h.bf16 %v251_v10  ;;  %v409_v22 = vunpack.c.l.bf16 %v746_v21  ;;  %v570_v33 = vld [vmem:[%s1073_s2 + $0x8] sm:$0xff] (!%p750_p5)  ;;  %v571_v34 = vld [vmem:[%s1073_s2 + $0x10] sm:$0xff] (!%p750_p5) }
  0x17   : > { %841 = vmatpush3.bf16.msra.mxu0 %v840_v5  ;;  %847 = vmatpush3.bf16.msra.mxu1 %v840_v5  ;;  %v487_v27 = vunpack.c.h.bf16 %v746_v21  ;;  %v569_v32 = vld [vmem:[%s1073_s2] sm:$0xff] (!%p750_p5)  ;;  %v943_v35 = vmov (!%p750_p5), 0.0|0.0   ;;  %v572_v37 = vld [vmem:[%s1073_s2 + $0x18] sm:$0xff] (!%p750_p5)  ;;  %vm944_vm3 = vmmov (!%p750_p5), 0   ;;  %v945_v38 = vmov (!%p750_p5), 0.0  }
  0x18   : > { %842 = vmatprep.subr.bf16.mxu0 %v940_v4  ;;  %848 = vmatprep.subr.bf16.mxu1 %v940_v4  ;;  %v864_v36 = vpack.c.bf16 (!%p750_p5), %v570_v33, %v569_v32  ;;  %v867_v39 = vpack.c.bf16 (!%p750_p5), %v572_v37, %v571_v34  ;;  %v751_v41 = vld [vmem:[%s1074_s3] ss:$0 sm:$0xff] (!%p750_p5) }
  0x19   : > { %v753_v63 = vld [vmem:[%s1075_s4] ss:$0 sm:$0xff] (!%p750_p5) }
  0x1a   : > { %v754_v1 = vld [vmem:[%s1076_s5] ss:$0 sm:$0xff] (!%p750_p5) }
  0x1b   : > { %844 = vmatpush3.bf16.msra.mxu0 %v843_v8  ;;  %850 = vmatpush3.bf16.msra.mxu1 %v843_v8 }
  0x1c   : > { %851 = vmatprep.subr.bf16.mxu0 %v940_v4  ;;  %857 = vmatprep.subr.bf16.mxu1 %v940_v4 }
  0x1e   : > { %793 = vmatmul.mubr.msk.f32.vlgmr.msra.gmra.mrb[0].mxu0 %vm253_vm2, %v250_v9 }
  0x1f   : > { %853 = vmatpush3.bf16.msra.mxu0 %v840_v5  ;;  %814 = vmatprep.mubr.msk.f32.mxu0 %vm941_vm1, %v942_v7 }
  0x20   : > { %854 = vmatprep.subr.bf16.mxu0 %v940_v4 }
  0x23   : > { %856 = vmatpush3.bf16.msra.mxu0 %v843_v8 }
  0x24   : > { %863 = vmatprep.subr.bf16.mxu0 (!%p750_p5), %v943_v35 }
  0xf1   : > { %v323_v12 = vpop.f32.mrb[0].mxu0 }
  0xf2   : > { %v327_v13 = vadd.f32 %v323_v12, %v252_v11  ;;  %v794_v14 = vpop.f32.mrb[1].mxu0 }
  0xf4   : > { %891 = vtanh.f32 %v327_v13 }
  0xfe   : > { %v892_v15 = vpop.eup %891 }
  0xff   : > { %804 = vmatmul.mubr.msk.f32.vlgmr.msra.gmra.mrb[0].mxu1 %vm253_vm2, %v892_v15 }
 0x100   : > { %859 = vmatpush3.bf16.msra.mxu1 %v840_v5  ;;  %825 = vmatprep.mubr.msk.f32.mxu1 %vm941_vm1, %v942_v7 }
 0x101   : > { %860 = vmatprep.subr.bf16.mxu1 %v940_v4 }
 0x104   : > { %862 = vmatpush3.bf16.msra.mxu1 %v843_v8 }
 0x1d2   : > { %v401_v17 = vpop.f32.mrb[0].mxu1 }
 0x1d3   : > { %v405_v18 = vadd.f32 %v401_v17, %v331_v16  ;;  %v805_v19 = vpop.f32.mrb[1].mxu1 }
 0x1d5   : > { %893 = vtanh.f32 %v405_v18 }
 0x1df   : > { %v894_v20 = vpop.eup %893 }
 0x1e0   : > { %815 = vmatmul.mubr.msk.f32.vlgmr.msra.gmra.mrb[2].mxu0 %vm253_vm2, %v894_v20 }
 0x1e1   : > { %836 = vmatprep.mubr.msk.f32.mxu0 (!%p750_p5), %vm944_vm3, %v945_v38  ;;  %865 = vmatpush3.bf16.msra.mxu0 (!%p750_p5), %v864_v36 }
 0x1e2   : > { %866 = vmatprep.subr.bf16.mxu0 (!%p750_p5), %v943_v35 }
 0x1e5   : > { %868 = vmatpush3.bf16.msra.mxu0 (!%p750_p5), %v867_v39 }
 0x2b3   : > { %v479_v23 = vpop.f32.mrb[2].mxu0 }
 0x2b4   : > { %v483_v24 = vadd.f32 %v479_v23, %v409_v22  ;;  %v816_v25 = vpop.f32.mrb[3].mxu0 }
 0x2b6   : > { %895 = vtanh.f32 %v483_v24 }
 0x2c0   : > { %v896_v26 = vpop.eup %895 }
 0x2c1   : > { %826 = vmatmul.mubr.msk.f32.vlgmr.msra.gmra.mrb[2].mxu1 %vm253_vm2, %v896_v26 }
 0x394   : > { %v557_v28 = vpop.f32.mrb[2].mxu1 }
 0x395   : > { %v561_v29 = vadd.f32 %v557_v28, %v487_v27  ;;  %v827_v30 = vpop.f32.mrb[3].mxu1 }
 0x397   : > { %897 = vtanh.f32 %v561_v29 }
 0x39c   : > { %567 = sbr.rel (%p750_p5) target bundleno = 1204 (0x4b4), region = 52 }
 0x3a1   : > { %v898_v31 = vpop.eup %897 }
 0x3a2   : > { %563 = vst.msk [vmem:[#allocation2] sm:$0xff] %vm253_vm2, %v898_v31 }
 0x3a9   : > { %v568_v40 = vld [vmem:[#allocation2] sm:$0xff] }
 0x3aa   : > { %837 = vmatmul.mubr.msk.f32.vlgmr.msra.gmra.mrb[0].mxu0 %vm253_vm2, %v568_v40 }
 0x47d   : > { %v649_v42 = vpop.f32.mrb[0].mxu0 }
 0x47e   : > { %v650_v43 = vadd.f32 %v751_v41, %v649_v42  ;;  %v838_v44 = vpop.f32.mrb[1].mxu0 }
 0x480   : > { %v653_v45 = vrot.slane %v650_v43, 4 }
 0x482   : > { %v654_v46 = vadd.f32 %v653_v45, %v650_v43 }
 0x484   : > { %v655_v47 = vrot.slane %v654_v46, 2 }
 0x486   : > { %v656_v48 = vadd.f32 %v655_v47, %v654_v46 }
 0x488   : > { %v657_v49 = vrot.slane %v656_v48, 1 }
 0x48a   : > { %v658_v50 = vadd.f32 %v657_v49, %v656_v48 }
 0x48c   : > { %v660_v51 = vmul.f32 0.125, %v658_v50 }
 0x48e   : > { %v661_v52 = vsub.f32 %v650_v43, %v660_v51 }
 0x490   : > { %v662_v53 = vmul.f32 %v661_v52, %v661_v52 }
 0x492   : > { %v663_v54 = vrot.slane %v662_v53, 4 }
 0x494   : > { %v664_v55 = vadd.f32 %v663_v54, %v662_v53 }
 0x496   : > { %v665_v56 = vrot.slane %v664_v55, 2 }
 0x498   : > { %v666_v57 = vadd.f32 %v665_v56, %v664_v55 }
 0x49a   : > { %v667_v58 = vrot.slane %v666_v57, 1 }
 0x49c   : > { %v668_v59 = vadd.f32 %v667_v58, %v666_v57 }
 0x49e   : > { %v669_v60 = vmul.f32 0.125, %v668_v59 }
 0x4a0   : > { %v670_v61 = vadd.f32 1e-05, %v669_v60 }
 0x4a2   : > { %899 = vrsqrt.f32 %v670_v61 }
 0x4ac   : > { %v900_v62 = vpop.eup %899 }
 0x4ad   : > { %v672_v0 = vmul.f32 %v900_v62, %v661_v52 }
 0x4af   : > { %v680_v2 = vmul.f32 %v753_v63, %v672_v0 }
 0x4b1   : > { %v688_v3 = vadd.f32 %v754_v1, %v680_v2 }
 0x4b3   : > { %689 = vst [vmem:[#allocation3] sm:$0xff] %v688_v3 }
 0x4b4 PF: > { %p873_p6 = scmp.eq.s32.totalorder %s988_s22, 1  ;;  %s946_s28 = smov [#allocation3]  }
 0x4b5   : > { %s697_s29 = sshll.u32 %s946_s28, 4  ;;  %s698_s29 = int_to_ptr.vmem [resolvable:$true] %s697_s29 }
 0x4b6   : > { %s901_s30 = scalar_lea.vmem %s698_s29, 128  ;;  %p908_p10 = scmp.lt.s32.totalorder %s698_s29, %s698_s29 }
 0x4b7   : > { %p902_p7 = scmp.ne.s32.totalorder %s698_s29, %s901_s30  ;;  %p909_p11 = scmp.lt.s32.totalorder %s901_s30, %s901_s30 }
 0x4b9   : > { %p903_p8 = pnand %p902_p7, %p873_p6  ;;  %p910_p12 = por %p909_p11, %p908_p10 }
 0x4bb   : > { %p904_p9 = pneg %p903_p8 }
 0x4bd   : > { %p911_p13 = pnand %p910_p12, %p904_p9 }
 0x4bf   : > { %914 = shalt.err (!%p911_p13)
}
 0x4c0   : > { %s915_s9 = scalar_lea.hbm %s1077_s6, 128 }
 0x4c1   : > { %p916_p0 = scmp.ne.s32.totalorder %s1077_s6, %s915_s9  ;;  %p921_p3 = scmp.lt.u32.totalorder %s915_s9, %s1077_s6 }
 0x4c3   : > { %p917_p1 = pnand %p916_p0, %p873_p6 }
 0x4c5   : > { %p918_p2 = pneg %p917_p1 }
 0x4c7   : > { %p923_p4 = pnand %p921_p3, %p918_p2 }
 0x4c9   : > { %926 = shalt.err (!%p923_p4)
}
 0x4ca   : > { %870 = dma.vmem_to_hbm [thread:$0]  (%p873_p6), %s698_s29, 128, %s1077_s6, [#allocation4]  }
 0x4cb   : > { %932 = dma.done.wait (%p873_p6), [#allocation4], 128  }
 0x4cc   : > { %934 = vsyncadd (%p873_p6), [#allocation4], 4294967168 }
 0x4cd PF: > { %s17_s21 = sadd.s32 1, %s937_s21  }
 0x4ce   : > { %p14_p5 = scmp.ge.s32.totalorder %s17_s21, 4  }
 0x4d0   :  { %16 = sbr.rel (!%p14_p5) target bundleno = 1 (0x1), region = 82 }
 0x4d7   :  { %710 = vsyncpa [#allocation4], 1 }
 0x4d8   :  { %712 = vsyncpa [#allocation4 + $0x1], 1 }

</bundles_post_ra>
